<compile_context>
chip_gen: v7x
topology: tpu7x:2x2x1
jax: 0.10.0
libtpu: 0.0.40
codegen_flags: <defaults>
</compile_context>

<pallas_src>
import functools

import jax
import jax.numpy as jnp
from jax.experimental import pallas as pl
from jax.experimental.pallas import tpu as pltpu


# ----------------------------------------------------------------------------
# Kernels
# ----------------------------------------------------------------------------
def _gcn_single_kernel(adj_ref, x_ref, b_ref, o_ref):
    """Whole problem in VMEM: out = adj @ x + bias (no grid)."""
    o_ref[...] = (
        jnp.dot(adj_ref[...], x_ref[...], preferred_element_type=jnp.float32)
        + b_ref[...]
    ).astype(o_ref.dtype)


def _gcn_stream_kernel(adj_ref, x_ref, b_ref, o_ref):
    """Tiled path, x streamed as (tk, tn) tiles. Output tile is the resident
    f32 accumulator across the k (reduction) grid axis; bias folded into the
    k==0 init."""
    k = pl.program_id(2)

    @pl.when(k == 0)
    def _():
        o_ref[...] = jnp.broadcast_to(b_ref[...], o_ref.shape).astype(o_ref.dtype)

    o_ref[...] += jnp.dot(
        adj_ref[...], x_ref[...], preferred_element_type=jnp.float32
    )


def _gcn_xres_kernel(adj_ref, x_ref, b_ref, o_ref, *, tk, tn):
    """Tiled path with x fully resident in VMEM (block index constant across
    the whole grid -> fetched once). adj is the only streamed operand. The
    (tk, tn) slab of x for this grid step is sliced in-kernel with aligned
    dynamic slices."""
    j = pl.program_id(1)
    k = pl.program_id(2)

    @pl.when(k == 0)
    def _():
        o_ref[...] = jnp.broadcast_to(b_ref[...], o_ref.shape).astype(o_ref.dtype)

    ks = pl.multiple_of(k * tk, 128)
    js = pl.multiple_of(j * tn, 128)
    x_tile = x_ref[pl.ds(ks, tk), pl.ds(js, tn)]
    o_ref[...] += jnp.dot(adj_ref[...], x_tile, preferred_element_type=jnp.float32)


# ----------------------------------------------------------------------------
# Helpers
# ----------------------------------------------------------------------------
def _round_up(v, m):
    return -(-v // m) * m


def _largest_divisor_tile(dim, desired, align):
    """Largest multiple of `align` that divides `dim` and is <= desired.
    `dim` must itself be a multiple of `align`."""
    desired = max(desired, align)
    best = align
    t = align
    limit = min(desired, dim)
    while t <= limit:
        if dim % t == 0:
            best = t
        t += align
    return best


def _pad2d(a, rows, cols):
    r, c = a.shape
    if rows == r and cols == c:
        return a  # skip jnp.pad (no extra HBM copy) when already aligned
    return jnp.pad(a, ((0, rows - r), (0, cols - c)))


def _pad_bias(b, cols):
    f = b.shape[0]
    bp = b if cols == f else jnp.pad(b, (0, cols - f))
    return bp.reshape(1, cols)


def _vmem_limit(need_bytes):
    # Conservative cap: well under v7x's 64 MiB physical VMEM, comfortably
    # inside v5e/v6e's 128 MiB; always >= the 32 MiB v6e/v7x scoped default.
    return int(min(max(need_bytes + (4 << 20), 32 << 20), 48 << 20))


# Grid-free fast path when all padded dims fit in a single VMEM block.
_SMALL_LIMIT = 1024
# Budget for holding x fully resident (conservatively counts 2 buffers).
_VMEM_SOFT_CAP = 40 * 1024 * 1024


# ----------------------------------------------------------------------------
# Wrapper
# ----------------------------------------------------------------------------
@functools.partial(
    jax.jit,
    static_argnames=("tm", "tn", "tk", "compute_dtype", "x_vmem_budget_bytes"),
)
def gnn_forward(
    x,
    adj,
    bias,
    *,
    tm=512,
    tn=512,
    tk=1024,
    compute_dtype=jnp.bfloat16,
    x_vmem_budget_bytes=_VMEM_SOFT_CAP,
):
    """Computes adj @ x + bias (GraphConvolution forward; weight unused, as in
    the PyTorch module). adj/x are streamed in `compute_dtype` (bf16 default,
    f32 accumulation); bias and output stay f32."""
    n_nodes, nfeat = x.shape
    assert adj.shape == (n_nodes, n_nodes)
    assert bias.shape == (nfeat,), (
        "bias (nhid,) must match feature dim (the PyTorch module's bias "
        "broadcast only makes sense when nfeat == nhid)"
    )

    in_dtype = jnp.dtype(compute_dtype)
    itemsize = in_dtype.itemsize
    adj_c = adj.astype(in_dtype)
    x_c = x.astype(in_dtype)
    bias_c = bias.astype(jnp.float32)

    m8 = _round_up(n_nodes, 8)
    k128 = _round_up(n_nodes, 128)
    f128 = _round_up(nfeat, 128)

    # ---------------- single-block (grid-free) fast path ----------------
    if m8 <= _SMALL_LIMIT and k128 <= _SMALL_LIMIT and f128 <= _SMALL_LIMIT:
        adj_p = _pad2d(adj_c, m8, k128)
        x_p = _pad2d(x_c, k128, f128)
        b_p = _pad_bias(bias_c, f128)
        need = (
            m8 * k128 * itemsize + k128 * f128 * itemsize + m8 * f128 * 4 + f128 * 4
        )
        out = pl.pallas_call(
            _gcn_single_kernel,
            out_shape=jax.ShapeDtypeStruct((m8, f128), jnp.float32),
            in_specs=[pl.BlockSpec(memory_space=pltpu.MemorySpace.VMEM)] * 3,
            out_specs=pl.BlockSpec(memory_space=pltpu.MemorySpace.VMEM),
            compiler_params=pltpu.CompilerParams(vmem_limit_bytes=_vmem_limit(need)),
        )(adj_p, x_p, b_p)
        return out[:n_nodes, :nfeat]

    # ---------------- tiled, pipelined path for large graphs ----------------
    # Pad only to small alignment quanta (M->64, K/F->128) and choose tile
    # sizes as the largest aligned divisors of the padded dims (no tile-
    # granularity padding of the dominant N^2 adj array).
    m_pad = _round_up(n_nodes, 64)
    k_pad = k128
    f_pad = f128
    tm_ = _largest_divisor_tile(m_pad, tm, 64)
    tk_ = _largest_divisor_tile(k_pad, tk, 128)
    tn_ = _largest_divisor_tile(f_pad, tn, 128)

    adj_p = _pad2d(adj_c, m_pad, k_pad)   # K padded with zeros -> reduction-safe
    x_p = _pad2d(x_c, k_pad, f_pad)
    b_p = _pad_bias(bias_c, f_pad)

    grid = (m_pad // tm_, f_pad // tn_, k_pad // tk_)

    # VMEM budget (conservatively assume every input/output block is
    # double-buffered by the pipeline).
    adj_tiles = 2 * tm_ * tk_ * itemsize
    out_tiles = 2 * tm_ * tn_ * 4
    bias_tiles = 2 * tn_ * 4
    x_resident_bytes = 2 * k_pad * f_pad * itemsize
    x_stream_bytes = 2 * tk_ * tn_ * itemsize

    resident_need = adj_tiles + out_tiles + bias_tiles + x_resident_bytes
    use_resident_x = resident_need <= min(int(x_vmem_budget_bytes), _VMEM_SOFT_CAP)

    if use_resident_x:
        # x block index is constant over the whole grid -> DMA'd from HBM once.
        kernel = functools.partial(_gcn_xres_kernel, tk=tk_, tn=tn_)
        x_spec = pl.BlockSpec((k_pad, f_pad), lambda i, j, k: (0, 0))
        need = resident_need
    else:
        kernel = _gcn_stream_kernel
        x_spec = pl.BlockSpec((tk_, tn_), lambda i, j, k: (k, j))
        need = adj_tiles + out_tiles + bias_tiles + x_stream_bytes

    out = pl.pallas_call(
        kernel,
        out_shape=jax.ShapeDtypeStruct((m_pad, f_pad), jnp.float32),
        grid_spec=pltpu.PrefetchScalarGridSpec(
            num_scalar_prefetch=0,
            grid=grid,
            in_specs=[
                # adj tile: rows i, reduction slab k (the only per-k-step DMA
                # when x is resident).
                pl.BlockSpec((tm_, tk_), lambda i, j, k: (i, k)),
                x_spec,
                # bias: lane-dense broadcast row for feature cols j
                pl.BlockSpec((1, tn_), lambda i, j, k: (0, j)),
            ],
            # Output block index constant across k -> resident f32 accumulator.
            out_specs=pl.BlockSpec((tm_, tn_), lambda i, j, k: (i, j)),
        ),
        compiler_params=pltpu.CompilerParams(
            dimension_semantics=("parallel", "parallel", "arbitrary"),
            vmem_limit_bytes=_vmem_limit(need),
        ),
    )(adj_p, x_p, b_p)
    return out[:n_nodes, :nfeat]


def init_gnn_params(key, nfeat, nhid):
    """Deterministic parameter init mirroring GraphConvolution.reset_parameters.

    Only `bias` is used in the forward pass; `weight` is created for shape
    fidelity but never applied (matching the PyTorch module's forward)."""
    stdv = 1.0 / (nhid ** 0.5)
    kw, kb = jax.random.split(key)
    weight = jax.random.uniform(
        kw, (nfeat, nhid), minval=-stdv, maxval=stdv, dtype=jnp.float32
    )
    bias = jax.random.uniform(
        kb, (nhid,), minval=-stdv, maxval=stdv, dtype=jnp.float32
    )
    return weight, bias


# ----------------------------------------------------------------------------
# Demo / self-check
# ----------------------------------------------------------------------------
if __name__ == "__main__":
    key = jax.random.PRNGKey(0)
    kA, kB = jax.random.split(key)

    def make_case(k, n, f):
        kx, ka, kp = jax.random.split(k, 3)
        x = jax.random.normal(kx, (n, f), dtype=jnp.float32)
        adj = jax.random.uniform(ka, (n, n), dtype=jnp.float32)
        adj = adj / jnp.sum(adj, axis=1, keepdims=True)  # row-normalized dense adj
        _w_unused, b = init_gnn_params(kp, f, f)
        return x, adj, b

    def ref_f32(x, adj, b):
        return jnp.matmul(adj, x, precision=jax.lax.Precision.HIGHEST) + b[None, :]

    def ref_bf16(x, adj, b):
        # Same arithmetic the bf16 MXU path performs: bf16-quantized operands,
        # exact f32 accumulation.
        a32 = adj.astype(jnp.bfloat16).astype(jnp.float32)
        x32 = x.astype(jnp.bfloat16).astype(jnp.float32)
        return jnp.matmul(a32, x32, precision=jax.lax.Precision.HIGHEST) + b[None, :]

    # Case 1: small, non-128-aligned graph -> grid-free single-block path
    # (exercises padding). Default bf16 streaming + explicit f32 path.
    x1, adj1, b1 = make_case(kA, 200, 72)
    o1 = gnn_forward(x1, adj1, b1)  # bf16 default
    jax.block_until_ready(o1)
    assert o1.shape == (200, 72)
    assert jnp.allclose(o1, ref_bf16(x1, adj1, b1), atol=1e-4, rtol=1e-3)
    assert jnp.allclose(o1, ref_f32(x1, adj1, b1), atol=3e-2, rtol=3e-2)

    o1f = gnn_forward(x1, adj1, b1, compute_dtype=jnp.float32)
    jax.block_until_ready(o1f)
    assert jnp.allclose(o1f, ref_f32(x1, adj1, b1), atol=2e-3, rtol=2e-3)

    # Case 2: larger graph -> tiled path with x fully resident in VMEM
    # (adj streamed once in bf16, f32 accumulation in the resident out tile).
    x2, adj2, b2 = make_case(kB, 1536, 384)
    o2 = gnn_forward(x2, adj2, b2)  # bf16 default, x-resident tiled path
    jax.block_until_ready(o2)
    assert o2.shape == (1536, 384)
    assert jnp.allclose(o2, ref_bf16(x2, adj2, b2), atol=1e-4, rtol=1e-3)
    assert jnp.allclose(o2, ref_f32(x2, adj2, b2), atol=1e-2, rtol=1e-2)

    # Case 3: same graph, f32 compute with the streamed-x fallback forced
    # (x_vmem_budget_bytes=0) -> exercises the third kernel.
    o3 = gnn_forward(
        x2, adj2, b2, compute_dtype=jnp.float32, x_vmem_budget_bytes=0
    )
    jax.block_until_ready(o3)
    assert jnp.allclose(o3, ref_f32(x2, adj2, b2), atol=2e-3, rtol=2e-3)

    print("KERNEL_OK")
</pallas_src>

<mosaic_0001>
module attributes {stable_mosaic.version = 11 : i64} {
  func.func @_gcn_single_kernel(%arg0: memref<200x256xbf16, #tpu.memory_space<vmem>>, %arg1: memref<256x128xbf16, #tpu.memory_space<vmem>>, %arg2: memref<1x128xf32, #tpu.memory_space<vmem>>, %arg3: memref<200x128xf32, #tpu.memory_space<vmem>>) attributes {dimension_semantics = [], scalar_prefetch = 0 : i64, scratch_operands = 0 : i64, tpu.core_type = #tpu.core_type<tc>} {
    %c0 = arith.constant 0 : index
    %c0_0 = arith.constant 0 : index
    %0 = vector.load %arg0[%c0, %c0_0] : memref<200x256xbf16, #tpu.memory_space<vmem>>, vector<200x256xbf16>
    %c0_1 = arith.constant 0 : index
    %c0_2 = arith.constant 0 : index
    %1 = vector.load %arg1[%c0_1, %c0_2] : memref<256x128xbf16, #tpu.memory_space<vmem>>, vector<256x128xbf16>
    %cst = arith.constant dense<0.000000e+00> : vector<200x128xf32>
    %2 = tpu.matmul %0, %1, %cst {dimension_numbers = #tpu.dot_dimension_numbers<[1], [0], [0], [1], [0, 0, 1, 1], [], []>} : vector<200x256xbf16>, vector<256x128xbf16>, vector<200x128xf32> -> vector<200x128xf32>
    %c0_3 = arith.constant 0 : index
    %c0_4 = arith.constant 0 : index
    %3 = vector.load %arg2[%c0_3, %c0_4] : memref<1x128xf32, #tpu.memory_space<vmem>>, vector<1x128xf32>
    %4 = vector.broadcast %3 : vector<1x128xf32> to vector<200x128xf32>
    %5 = arith.addf %2, %4 : vector<200x128xf32>
    %c0_5 = arith.constant 0 : index
    %c0_6 = arith.constant 0 : index
    %6 = vector.load %arg3[%c0_5, %c0_6] : memref<200x128xf32, #tpu.memory_space<vmem>>, vector<200x128xf32>
    tpu.vector_store %arg3[%c0_5, %c0_6], %5 {strides = array<i32>} : memref<200x128xf32, #tpu.memory_space<vmem>>, vector<200x128xf32>,
    return
  }
}

</mosaic_0001>

<bundles_post_ra>
// kernel: gnn_forward.1
= control target key start
LH: loop header
LB: loop body
LE: loop exit
PB: predicated region body
PF: predicated region fallthrough
CT: control target
= control target key end

     0   :  { %s922_s1 = inlined_call_operand.vmem [shape: bf16[256,128], index: 1, kind: input, shape index: {}]   ;;  %s923_s0 = inlined_call_operand.vmem [shape: bf16[200,256], index: 0, kind: input, shape index: {}]   ;;  %s924_s2 = inlined_call_operand.vmem [shape: f32[1,128], index: 2, kind: input, shape index: {}]   ;;  %s925_s3 = inlined_call_operand.vmem [shape: f32[200,128], index: 3, kind: output, shape index: {}]  }
   0x1   :  { %v620_v0 = vld [vmem:[%s922_s1 + $0x40] sm:$0xff]   ;;  %v622_v2 = vld [vmem:[%s922_s1 + $0x48] sm:$0xff]   ;;  %v624_v4 = vld [vmem:[%s922_s1 + $0x50] sm:$0xff]  }
   0x2   :  { %v621_v1 = vld [vmem:[%s922_s1] sm:$0xff]   ;;  %510 = vmatprep.subr.bf16.mxu0 %v620_v0  ;;  %604 = vmatprep.subr.bf16.mxu1 %v620_v0  ;;  %v623_v3 = vld [vmem:[%s922_s1 + $0x8] sm:$0xff]   ;;  %v625_v5 = vld [vmem:[%s922_s1 + $0x10] sm:$0xff]  }
   0x3   :  { %511 = vmatpush3.bf16.msra.mxu0 %v621_v1  ;;  %612 = vmatpush3.bf16.msra.mxu1 %v621_v1  ;;  %v626_v6 = vld [vmem:[%s922_s1 + $0x58] sm:$0xff]   ;;  %v628_v8 = vld [vmem:[%s922_s1 + $0x60] sm:$0xff]   ;;  %v630_v10 = vld [vmem:[%s922_s1 + $0x68] sm:$0xff]  }
   0x4   :  { %512 = vmatprep.subr.bf16.mxu0 %v622_v2  ;;  %605 = vmatprep.subr.bf16.mxu1 %v622_v2  ;;  %v627_v7 = vld [vmem:[%s922_s1 + $0x18] sm:$0xff]   ;;  %v629_v9 = vld [vmem:[%s922_s1 + $0x20] sm:$0xff]   ;;  %v631_v13 = vld [vmem:[%s922_s1 + $0x28] sm:$0xff]  }
   0x5   :  { %v638_v11 = vld [vmem:[%s923_s0 + $0x4] ss:$8 sps:$4 sm:$0xff]   ;;  %v641_v12 = vld [vmem:[%s923_s0 + $0x74] ss:$8 sps:$4 sm:$0xff]   ;;  %v636_v18 = vld [vmem:[%s923_s0] ss:$8 sps:$4 sm:$0xff]  }
   0x6   :  { %v632_v14 = vld [vmem:[%s922_s1 + $0x70] sm:$0xff]   ;;  %334 = vmatprep.mubr.bf16.mxu0 %v638_v11  ;;  %390 = vmatprep.mubr.bf16.mxu1 %v641_v12  ;;  %v634_v16 = vld [vmem:[%s922_s1 + $0x78] sm:$0xff]   ;;  %v645_v21 = vld [vmem:[%s923_s0 + $0x84] ss:$8 sps:$4 sm:$0xff]  }
   0x7   :  { %513 = vmatpush3.bf16.msra.mxu0 %v623_v3  ;;  %613 = vmatpush3.bf16.msra.mxu1 %v623_v3  ;;  %v633_v15 = vld [vmem:[%s922_s1 + $0x30] sm:$0xff]   ;;  %v635_v17 = vld [vmem:[%s922_s1 + $0x38] sm:$0xff]   ;;  %v649_v23 = vld [vmem:[%s923_s0 + $0x80] ss:$8 sps:$4 sm:$0xff]  }
   0x8   :  { %514 = vmatprep.subr.bf16.mxu0 %v624_v4  ;;  %606 = vmatprep.subr.bf16.mxu1 %v624_v4  ;;  %v639_v19 = vld [vmem:[%s923_s0 + $0x70] ss:$8 sps:$4 sm:$0xff]   ;;  %v642_v20 = vld [vmem:[%s923_s0 + $0x14] ss:$8 sps:$4 sm:$0xff]   ;;  %v647_v24 = vld [vmem:[%s923_s0 + $0x24] ss:$8 sps:$4 sm:$0xff]  }
   0x9   :  { %v644_v22 = vld [vmem:[%s923_s0 + $0x10] ss:$8 sps:$4 sm:$0xff]   ;;  %v651_v25 = vld [vmem:[%s923_s0 + $0x94] ss:$8 sps:$4 sm:$0xff]   ;;  %v650_v26 = vld [vmem:[%s923_s0 + $0x20] ss:$8 sps:$4 sm:$0xff]  }
   0xa   :  { %v655_v27 = vld [vmem:[%s923_s0 + $0x90] ss:$8 sps:$4 sm:$0xff]   ;;  %v653_v28 = vld [vmem:[%s923_s0 + $0x34] ss:$8 sps:$4 sm:$0xff]   ;;  %v657_v29 = vld [vmem:[%s923_s0 + $0xa4] ss:$8 sps:$4 sm:$0xff]  }
   0xb   :  { %515 = vmatpush3.bf16.msra.mxu0 %v625_v5  ;;  %614 = vmatpush3.bf16.msra.mxu1 %v625_v5  ;;  %v656_v30 = vld [vmem:[%s923_s0 + $0x30] ss:$8 sps:$4 sm:$0xff]   ;;  %v661_v31 = vld [vmem:[%s923_s0 + $0xa0] ss:$8 sps:$4 sm:$0xff]   ;;  %v659_v32 = vld [vmem:[%s923_s0 + $0x44] ss:$8 sps:$4 sm:$0xff]  }
   0xc   :  { %516 = vmatprep.subr.bf16.mxu0 %v626_v6  ;;  %607 = vmatprep.subr.bf16.mxu1 %v626_v6  ;;  %v663_v33 = vld [vmem:[%s923_s0 + $0xb4] ss:$8 sps:$4 sm:$0xff]   ;;  %v39_v34 = vld [vmem:[%s923_s0 + $0xc0] sm:$0xff]  ;;  %v667_v36 = vld [vmem:[%s923_s0 + $0xb0] ss:$8 sps:$4 sm:$0xff]  }
   0xd   :  { %v662_v35 = vld [vmem:[%s923_s0 + $0x40] ss:$8 sps:$4 sm:$0xff]   ;;  %v665_v37 = vld [vmem:[%s923_s0 + $0x54] ss:$8 sps:$4 sm:$0xff]   ;;  %v493_v38 = vcombine.high %v39_v34, %v39_v34  ;;  %v668_v39 = vld [vmem:[%s923_s0 + $0x50] ss:$8 sps:$4 sm:$0xff]   ;;  %v492_v40 = vcombine.low %v39_v34, %v39_v34 }
   0xe   :  { %v670_v41 = vld [vmem:[%s923_s0 + $0x64] ss:$8 sps:$4 sm:$0xff]   ;;  %v673_v42 = vld [vmem:[%s923_s0 + $0x60] ss:$8 sps:$4 sm:$0xff]  }
   0xf   :  { %517 = vmatpush3.bf16.msra.mxu0 %v627_v7  ;;  %615 = vmatpush3.bf16.msra.mxu1 %v627_v7  ;;  %v820_v45 = vld [vmem:[%s924_s2] ss:$0 sm:$0xff] }
  0x10   :  { %518 = vmatprep.subr.bf16.mxu0 %v628_v8  ;;  %608 = vmatprep.subr.bf16.mxu1 %v628_v8 }
  0x13   :  { %519 = vmatpush3.bf16.msra.mxu0 %v629_v9  ;;  %616 = vmatpush3.bf16.msra.mxu1 %v629_v9 }
  0x14   :  { %520 = vmatprep.subr.bf16.mxu0 %v630_v10  ;;  %609 = vmatprep.subr.bf16.mxu1 %v630_v10 }
  0x17   :  { %521 = vmatpush3.bf16.msra.mxu0 %v631_v13  ;;  %617 = vmatpush3.bf16.msra.mxu1 %v631_v13 }
  0x18   :  { %522 = vmatprep.subr.bf16.mxu0 %v632_v14  ;;  %610 = vmatprep.subr.bf16.mxu1 %v632_v14 }
  0x1b   :  { %523 = vmatpush3.bf16.msra.mxu0 %v633_v15  ;;  %618 = vmatpush3.bf16.msra.mxu1 %v633_v15 }
  0x1c   :  { %524 = vmatprep.subr.bf16.mxu0 %v634_v16  ;;  %611 = vmatprep.subr.bf16.mxu1 %v634_v16 }
  0x1f   :  { %525 = vmatpush3.bf16.msra.mxu0 %v635_v17  ;;  %619 = vmatpush3.bf16.msra.mxu1 %v635_v17 }
  0x22   :  { %335 = vmatmul.mubr.bf16.vlgmr.msra.gmra.mrb[0].mxu0 %v636_v18  ;;  %391 = vmatmul.mubr.bf16.vlgmr.msra.gmra.mrb[0].mxu1 %v639_v19 }
  0x23   :  { %342 = vmatprep.mubr.bf16.mxu0 %v642_v20  ;;  %398 = vmatprep.mubr.bf16.mxu1 %v645_v21 }
  0x2a   :  { %343 = vmatmul.mubr.bf16.gmra.mrb[4].mxu0 %v644_v22  ;;  %399 = vmatmul.mubr.bf16.gmra.mrb[4].mxu1 %v649_v23 }
  0x2b   :  { %350 = vmatprep.mubr.bf16.mxu0 %v647_v24  ;;  %406 = vmatprep.mubr.bf16.mxu1 %v651_v25 }
  0x32   :  { %351 = vmatmul.mubr.bf16.gmra.mrb[8].mxu0 %v650_v26  ;;  %407 = vmatmul.mubr.bf16.gmra.mrb[8].mxu1 %v655_v27 }
  0x33   :  { %358 = vmatprep.mubr.bf16.mxu0 %v653_v28  ;;  %414 = vmatprep.mubr.bf16.mxu1 %v657_v29 }
  0x3a   :  { %359 = vmatmul.mubr.bf16.gmra.mrb[12].mxu0 %v656_v30  ;;  %415 = vmatmul.mubr.bf16.gmra.mrb[12].mxu1 %v661_v31 }
  0x3b   :  { %366 = vmatprep.mubr.bf16.mxu0 %v659_v32  ;;  %422 = vmatprep.mubr.bf16.mxu1 %v663_v33 }
  0x42   :  { %367 = vmatmul.mubr.bf16.gmra.mrb[16].mxu0 %v662_v35  ;;  %423 = vmatmul.mubr.bf16.gmra.mrb[16].mxu1 %v667_v36 }
  0x43   :  { %374 = vmatprep.mubr.bf16.mxu0 %v665_v37  ;;  %430 = vmatprep.mubr.bf16.mxu1 %v493_v38 }
  0x4a   :  { %375 = vmatmul.mubr.bf16.gmra.mrb[20].mxu0 %v668_v39  ;;  %431 = vmatmul.mubr.bf16.gmra.mrb[20].mxu1 %v492_v40 }
  0x4b   :  { %382 = vmatprep.mubr.bf16.mxu0 %v670_v41 }
  0x52   :  { %383 = vmatmul.mubr.bf16.gmra.mrb[24].mxu0 %v673_v42 }
  0xf5   :  { %v526_v43 = vpop.f32.mrb[0].mxu0  ;;  %v568_v44 = vpop.f32.mrb[0].mxu1 }
  0xf6   :  { %v527_v46 = vpop.f32.mrb[1].mxu0  ;;  %v569_v47 = vpop.f32.mrb[1].mxu1 }
  0xf7   :  { %v528_v48 = vadd.f32 %v527_v46, %v526_v43  ;;  %v529_v49 = vpop.f32.mrb[2].mxu0  ;;  %v570_v50 = vadd.f32 %v569_v47, %v568_v44  ;;  %v571_v51 = vpop.f32.mrb[2].mxu1 }
  0xf8   :  { %v530_v52 = vpop.f32.mrb[3].mxu0  ;;  %v572_v53 = vpop.f32.mrb[3].mxu1 }
  0xf9   :  { %v337_v54 = vadd.f32 %v528_v48, %v820_v45  ;;  %v531_v55 = vadd.f32 %v530_v52, %v529_v49  ;;  %v393_v56 = vadd.f32 %v570_v50, %v820_v45  ;;  %v573_v57 = vadd.f32 %v572_v53, %v571_v51 }
  0xfb   :  { %438 = vst [vmem:[%s925_s3] sm:$0xff] %v337_v54  ;;  %v340_v58 = vadd.f32 %v531_v55, %v820_v45  ;;  %452 = vst [vmem:[%s925_s3 + $0x70] sm:$0xff] %v393_v56  ;;  %v396_v59 = vadd.f32 %v573_v57, %v820_v45 }
  0xfd   :  { %439 = vst [vmem:[%s925_s3 + $0x8] sm:$0xff] %v340_v58  ;;  %v532_v60 = vpop.f32.mrb[4].mxu0  ;;  %453 = vst [vmem:[%s925_s3 + $0x78] sm:$0xff] %v396_v59  ;;  %v574_v61 = vpop.f32.mrb[4].mxu1 }
  0xfe   :  { %v533_v62 = vpop.f32.mrb[5].mxu0  ;;  %v575_v63 = vpop.f32.mrb[5].mxu1 }
  0xff   :  { %v534_v0 = vadd.f32 %v533_v62, %v532_v60  ;;  %v535_v1 = vpop.f32.mrb[6].mxu0  ;;  %v576_v2 = vadd.f32 %v575_v63, %v574_v61  ;;  %v577_v3 = vpop.f32.mrb[6].mxu1 }
 0x100   :  { %v536_v4 = vpop.f32.mrb[7].mxu0  ;;  %v578_v5 = vpop.f32.mrb[7].mxu1 }
 0x101   :  { %v345_v6 = vadd.f32 %v534_v0, %v820_v45  ;;  %v537_v7 = vadd.f32 %v536_v4, %v535_v1  ;;  %v401_v8 = vadd.f32 %v576_v2, %v820_v45  ;;  %v579_v9 = vadd.f32 %v578_v5, %v577_v3 }
 0x103   :  { %440 = vst [vmem:[%s925_s3 + $0x10] sm:$0xff] %v345_v6  ;;  %v348_v10 = vadd.f32 %v537_v7, %v820_v45  ;;  %454 = vst [vmem:[%s925_s3 + $0x80] sm:$0xff] %v401_v8  ;;  %v404_v11 = vadd.f32 %v579_v9, %v820_v45 }
 0x105   :  { %441 = vst [vmem:[%s925_s3 + $0x18] sm:$0xff] %v348_v10  ;;  %v538_v12 = vpop.f32.mrb[8].mxu0  ;;  %455 = vst [vmem:[%s925_s3 + $0x88] sm:$0xff] %v404_v11  ;;  %v580_v13 = vpop.f32.mrb[8].mxu1 }
 0x106   :  { %v539_v14 = vpop.f32.mrb[9].mxu0  ;;  %v581_v15 = vpop.f32.mrb[9].mxu1 }
 0x107   :  { %v540_v16 = vadd.f32 %v539_v14, %v538_v12  ;;  %v541_v17 = vpop.f32.mrb[10].mxu0  ;;  %v582_v18 = vadd.f32 %v581_v15, %v580_v13  ;;  %v583_v19 = vpop.f32.mrb[10].mxu1 }
 0x108   :  { %v542_v20 = vpop.f32.mrb[11].mxu0  ;;  %v584_v21 = vpop.f32.mrb[11].mxu1 }
 0x109   :  { %v353_v22 = vadd.f32 %v540_v16, %v820_v45  ;;  %v543_v23 = vadd.f32 %v542_v20, %v541_v17  ;;  %v409_v24 = vadd.f32 %v582_v18, %v820_v45  ;;  %v585_v25 = vadd.f32 %v584_v21, %v583_v19 }
 0x10b   :  { %442 = vst [vmem:[%s925_s3 + $0x20] sm:$0xff] %v353_v22  ;;  %v356_v26 = vadd.f32 %v543_v23, %v820_v45  ;;  %456 = vst [vmem:[%s925_s3 + $0x90] sm:$0xff] %v409_v24  ;;  %v412_v27 = vadd.f32 %v585_v25, %v820_v45 }
 0x10d   :  { %443 = vst [vmem:[%s925_s3 + $0x28] sm:$0xff] %v356_v26  ;;  %v544_v28 = vpop.f32.mrb[12].mxu0  ;;  %457 = vst [vmem:[%s925_s3 + $0x98] sm:$0xff] %v412_v27  ;;  %v586_v29 = vpop.f32.mrb[12].mxu1 }
 0x10e   :  { %v545_v30 = vpop.f32.mrb[13].mxu0  ;;  %v587_v31 = vpop.f32.mrb[13].mxu1 }
 0x10f   :  { %v546_v32 = vadd.f32 %v545_v30, %v544_v28  ;;  %v547_v33 = vpop.f32.mrb[14].mxu0  ;;  %v588_v34 = vadd.f32 %v587_v31, %v586_v29  ;;  %v589_v35 = vpop.f32.mrb[14].mxu1 }
 0x110   :  { %v548_v36 = vpop.f32.mrb[15].mxu0  ;;  %v590_v37 = vpop.f32.mrb[15].mxu1 }
 0x111   :  { %v361_v38 = vadd.f32 %v546_v32, %v820_v45  ;;  %v549_v39 = vadd.f32 %v548_v36, %v547_v33  ;;  %v417_v40 = vadd.f32 %v588_v34, %v820_v45  ;;  %v591_v41 = vadd.f32 %v590_v37, %v589_v35 }
 0x113   :  { %444 = vst [vmem:[%s925_s3 + $0x30] sm:$0xff] %v361_v38  ;;  %v364_v42 = vadd.f32 %v549_v39, %v820_v45  ;;  %458 = vst [vmem:[%s925_s3 + $0xa0] sm:$0xff] %v417_v40  ;;  %v420_v43 = vadd.f32 %v591_v41, %v820_v45 }
 0x115   :  { %445 = vst [vmem:[%s925_s3 + $0x38] sm:$0xff] %v364_v42  ;;  %v550_v44 = vpop.f32.mrb[16].mxu0  ;;  %459 = vst [vmem:[%s925_s3 + $0xa8] sm:$0xff] %v420_v43  ;;  %v592_v46 = vpop.f32.mrb[16].mxu1 }
 0x116   :  { %v551_v47 = vpop.f32.mrb[17].mxu0  ;;  %v593_v48 = vpop.f32.mrb[17].mxu1 }
 0x117   :  { %v552_v49 = vadd.f32 %v551_v47, %v550_v44  ;;  %v553_v50 = vpop.f32.mrb[18].mxu0  ;;  %v594_v51 = vadd.f32 %v593_v48, %v592_v46  ;;  %v595_v52 = vpop.f32.mrb[18].mxu1 }
 0x118   :  { %v554_v53 = vpop.f32.mrb[19].mxu0  ;;  %v596_v54 = vpop.f32.mrb[19].mxu1 }
 0x119   :  { %v369_v55 = vadd.f32 %v552_v49, %v820_v45  ;;  %v555_v56 = vadd.f32 %v554_v53, %v553_v50  ;;  %v425_v57 = vadd.f32 %v594_v51, %v820_v45  ;;  %v597_v58 = vadd.f32 %v596_v54, %v595_v52 }
 0x11b   :  { %446 = vst [vmem:[%s925_s3 + $0x40] sm:$0xff] %v369_v55  ;;  %v372_v59 = vadd.f32 %v555_v56, %v820_v45  ;;  %460 = vst [vmem:[%s925_s3 + $0xb0] sm:$0xff] %v425_v57  ;;  %v428_v60 = vadd.f32 %v597_v58, %v820_v45 }
 0x11d   :  { %447 = vst [vmem:[%s925_s3 + $0x48] sm:$0xff] %v372_v59  ;;  %v556_v61 = vpop.f32.mrb[20].mxu0  ;;  %461 = vst [vmem:[%s925_s3 + $0xb8] sm:$0xff] %v428_v60  ;;  %v598_v62 = vpop.f32.mrb[20].mxu1 }
 0x11e   :  { %v557_v63 = vpop.f32.mrb[21].mxu0  ;;  %v599_v0 = vpop.f32.mrb[21].mxu1 }
 0x11f   :  { %v558_v1 = vadd.f32 %v557_v63, %v556_v61  ;;  %v559_v2 = vpop.f32.mrb[22].mxu0  ;;  %v600_v3 = vadd.f32 %v599_v0, %v598_v62  ;;  %v601_v4 = vpop.f32.mrb[22].mxu1 }
 0x120   :  { %v560_v5 = vpop.f32.mrb[23].mxu0  ;;  %v602_v6 = vpop.f32.mrb[23].mxu1 }
 0x121   :  { %v377_v7 = vadd.f32 %v558_v1, %v820_v45  ;;  %v561_v8 = vadd.f32 %v560_v5, %v559_v2  ;;  %v433_v9 = vadd.f32 %v600_v3, %v820_v45 }
 0x123   :  { %448 = vst [vmem:[%s925_s3 + $0x50] sm:$0xff] %v377_v7  ;;  %v380_v10 = vadd.f32 %v561_v8, %v820_v45  ;;  %462 = vst [vmem:[%s925_s3 + $0xc0] sm:$0xff] %v433_v9 }
 0x125   :  { %449 = vst [vmem:[%s925_s3 + $0x58] sm:$0xff] %v380_v10  ;;  %v562_v11 = vpop.f32.mrb[24].mxu0 }
 0x126   :  { %v563_v12 = vpop.f32.mrb[25].mxu0 }
 0x127   :  { %v564_v13 = vadd.f32 %v563_v12, %v562_v11  ;;  %v565_v14 = vpop.f32.mrb[26].mxu0 }
 0x128   :  { %v566_v15 = vpop.f32.mrb[27].mxu0 }
 0x129   :  { %v385_v16 = vadd.f32 %v564_v13, %v820_v45  ;;  %v567_v17 = vadd.f32 %v566_v15, %v565_v14 }
 0x12b   :  { %450 = vst [vmem:[%s925_s3 + $0x60] sm:$0xff] %v385_v16  ;;  %v388_v18 = vadd.f32 %v567_v17, %v820_v45 }
 0x12d   :  { %451 = vst [vmem:[%s925_s3 + $0x68] sm:$0xff] %v388_v18 }

</bundles_post_ra>
